<compile_context>
chip_gen: v5e
topology: v5e:2x2
jax: 0.10.0
libtpu: 0.0.40
codegen_flags: <defaults>
</compile_context>

<pallas_src>
import functools

import jax
import jax.numpy as jnp
from jax import lax
from jax.experimental import pallas as pl
from jax.experimental.pallas import tpu as pltpu


def _output_feature_dim(method: str, D: int) -> int:
    if method == "concat":
        return 2 * D
    if method == "diff":
        return D
    if method == "cmp":
        return 3 * D
    raise ValueError(f"Unknown input transform method: {method}")


def _vmem_capacity_bytes() -> int:
    try:
        return int(pltpu.get_tpu_info().vmem_capacity_bytes)
    except Exception:
        return 128 * 1024 * 1024  # v5e / v6e default


_TILE_CANDIDATES = (512, 256, 128, 64, 32, 16, 8)


def _choose_tile(N, F, out_budget_bytes, lane_dense):
    """Square pair-space tile T: (T, T, F) f32 out block fits the budget and is layout-legal."""

    def fits(t):
        return t * t * F * 4 <= out_budget_bytes

    def layout_ok(t):
        sub_ok = (t % 8 == 0) or (t == N)
        lane_ok = (not lane_dense) or ((t * F) % 128 == 0) or (t == N)
        return sub_ok and lane_ok

    # Whole i/j extent in one block (full-extent dims are always layout-legal).
    if N <= 512 and fits(N):
        return N
    for t in _TILE_CANDIDATES:
        if t <= N and layout_ok(t) and fits(t):
            return t
    if not lane_dense:
        return min(N, 8)  # last resort; slab path has no lane constraint
    return None


def _make_flat_kernel(method, exclude_self, D, F):
    """Lane-dense path.  Refs: xi_ref (1,T,D), xj_ref (1,T,D), o_ref (1,T,T*F)."""

    def kernel(xi_ref, xj_ref, o_ref):
        _, TI, _ = xi_ref.shape
        _, TJ, _ = xj_ref.shape
        xi_b = xi_ref[0][:, None, :]  # (TI, 1, D) -> broadcasts along j
        xj_b = xj_ref[0][None, :, :]  # (1, TJ, D) -> broadcasts along i

        if method == "concat":
            tile = jnp.concatenate(
                [jnp.broadcast_to(xi_b, (TI, TJ, D)).astype(jnp.float32),
                 jnp.broadcast_to(xj_b, (TI, TJ, D)).astype(jnp.float32)],
                axis=-1)
        elif method == "diff":
            tile = (xi_b - xj_b).astype(jnp.float32)
        elif method == "cmp":
            tile = jnp.concatenate(
                [(xi_b < xj_b).astype(jnp.float32),
                 (xi_b == xj_b).astype(jnp.float32),
                 (xi_b > xj_b).astype(jnp.float32)],
                axis=-1)
        else:
            raise ValueError(f"Unknown input transform method: {method}")

        def store(t):
            # Single contiguous, lane-dense (TJ*F is a multiple of 128 or full
            # extent) store: no vst.msk partial stores.
            o_ref[0] = t.reshape(TI, TJ * F)

        if exclude_self:
            # Square tiles: global i == j only occurs on diagonal tiles, where
            # the i- and j-blocks share the same offset -> local iota is valid.
            is_diag = pl.program_id(1) == pl.program_id(2)

            @pl.when(is_diag)
            def _():
                ii = lax.broadcasted_iota(jnp.int32, (TI, TJ, 1), 0)
                jj = lax.broadcasted_iota(jnp.int32, (TI, TJ, 1), 1)
                store(tile * (ii != jj).astype(jnp.float32))

            @pl.when(jnp.logical_not(is_diag))
            def _():
                store(tile)
        else:
            store(tile)

    return kernel


def _make_slab_kernel(method, exclude_self, D):
    """Slab-store path.  Refs: xi_ref (1,T,D), xj_ref (1,T,D), o_ref (1,T,T,F).
    Lane-aligned (unmasked) stores when D % 128 == 0; also the safe fallback."""

    def kernel(xi_ref, xj_ref, o_ref):
        _, TI, _ = xi_ref.shape
        _, TJ, _ = xj_ref.shape
        xi_b = xi_ref[0][:, None, :]
        xj_b = xj_ref[0][None, :, :]

        def emit(mask):
            def put(lo, val):
                val = jnp.broadcast_to(val, (TI, TJ, D)).astype(jnp.float32)
                if mask is not None:
                    val = val * mask
                o_ref[0, :, :, lo:lo + D] = val  # direct slab store

            if method == "concat":
                put(0, xi_b)
                put(D, xj_b)
            elif method == "diff":
                put(0, xi_b - xj_b)
            elif method == "cmp":
                put(0, (xi_b < xj_b).astype(jnp.float32))
                put(D, (xi_b == xj_b).astype(jnp.float32))
                put(2 * D, (xi_b > xj_b).astype(jnp.float32))
            else:
                raise ValueError(f"Unknown input transform method: {method}")

        if exclude_self:
            is_diag = pl.program_id(1) == pl.program_id(2)

            @pl.when(is_diag)
            def _():
                ii = lax.broadcasted_iota(jnp.int32, (TI, TJ, 1), 0)
                jj = lax.broadcasted_iota(jnp.int32, (TI, TJ, 1), 1)
                emit((ii != jj).astype(jnp.float32))

            @pl.when(jnp.logical_not(is_diag))
            def _():
                emit(None)
        else:
            emit(None)

    return kernel


@functools.partial(jax.jit, static_argnames=("method", "exclude_self", "tile", "flat"))
def _input_transform_impl(x, *, method, exclude_self, tile, flat):
    B, N, D = x.shape
    F = _output_feature_dim(method, D)

    # Generation-aware sizing: v7x has 64 MiB VMEM per TC, v5e/v6e have 128 MiB.
    cap = _vmem_capacity_bytes()
    out_budget = 8 * 1024 * 1024 if cap <= 64 * 1024 * 1024 else 16 * 1024 * 1024

    if tile is not None:
        T = int(tile)
        if flat and not ((T * F) % 128 == 0 or T == N):
            raise ValueError("tile override is not lane-dense for the flat path")
    else:
        T = _choose_tile(N, F, out_budget, lane_dense=flat)
        if T is None:
            # TODO(synk): add a feature-axis grid dimension for huge unaligned D
            # instead of falling back to masked (sub-128-lane) stores.
            raise ValueError("no lane-dense tile for the flat path")

    n_blk = pl.cdiv(N, T)
    grid = (B, n_blk, n_blk)  # j innermost: the i-rows input block stays resident

    in_specs = [
        pl.BlockSpec((1, T, D), lambda b, i, j: (b, i, 0)),  # i-rows view
        pl.BlockSpec((1, T, D), lambda b, i, j: (b, j, 0)),  # j-rows view
    ]
    if flat:
        kernel = _make_flat_kernel(method, exclude_self, D, F)
        out_shape = jax.ShapeDtypeStruct((B, N, N * F), jnp.float32)
        out_specs = pl.BlockSpec((1, T, T * F), lambda b, i, j: (b, i, j))
    else:
        kernel = _make_slab_kernel(method, exclude_self, D)
        out_shape = jax.ShapeDtypeStruct((B, N, N, F), jnp.float32)
        out_specs = pl.BlockSpec((1, T, T, F), lambda b, i, j: (b, i, j, 0))

    # Double-buffered in/out blocks + in-kernel relayout temporaries + slack,
    # capped below the chip's physical VMEM.
    out_block = T * T * F * 4
    in_block = T * D * x.dtype.itemsize
    vmem_limit = int(min(max(4 * out_block + 4 * in_block + (8 << 20), 32 << 20),
                         cap * 7 // 8))

    out = pl.pallas_call(
        kernel,
        out_shape=out_shape,
        grid_spec=pltpu.PrefetchScalarGridSpec(
            num_scalar_prefetch=0,
            grid=grid,
            in_specs=in_specs,
            out_specs=out_specs,
        ),
        compiler_params=pltpu.CompilerParams(
            # All axes independent; megacore shards parallel axes on v7x.
            dimension_semantics=("parallel", "parallel", "parallel"),
            vmem_limit_bytes=vmem_limit,
        ),
    )(x, x)

    if flat:
        out = out.reshape(B, N, N, F)  # contiguous reshape back to (B, N, N, F)
    # TODO(synk): emitting bf16 or fusing into the consumer would beat the f32
    # HBM-write roofline, but both change the module's output contract.
    return out


_IMPL_CACHE = {}


def _select_impl(shape, dtype, method, exclude_self, tile):
    B, N, D = shape
    if D % 128 != 0:
        # Probe-compile the lane-dense flattened-output path (the in-kernel
        # (T,T,F)->(T,T*F) relayout may not lower on every Mosaic version);
        # fall back to the always-compiling slab path on any failure.
        try:
            sds = jax.ShapeDtypeStruct(shape, dtype)
            _input_transform_impl.lower(
                sds, method=method, exclude_self=exclude_self, tile=tile, flat=True
            ).compile()
            return functools.partial(
                _input_transform_impl, method=method, exclude_self=exclude_self,
                tile=tile, flat=True)
        except Exception:
            pass
    return functools.partial(
        _input_transform_impl, method=method, exclude_self=exclude_self,
        tile=tile, flat=False)


def input_transform(x, *, method="concat", exclude_self=True, tile=None):
    """Pallas InputTransform.forward.  x: (B, N, D) -> (B, N, N, F) float32."""
    assert x.ndim == 3
    key = (tuple(x.shape), jnp.dtype(x.dtype).name, method, bool(exclude_self), tile)
    fn = _IMPL_CACHE.get(key)
    if fn is None:
        fn = _select_impl(tuple(x.shape), x.dtype, method, exclude_self, tile)
        _IMPL_CACHE[key] = fn
    return fn(x)


def _reference(x, method, exclude_self):
    """Pure-JAX reference mirroring the PyTorch module."""
    B, N, D = x.shape
    xi = jnp.broadcast_to(x[:, :, None, :], (B, N, N, D))
    yj = jnp.broadcast_to(x[:, None, :, :], (B, N, N, D))
    if method == "concat":
        combined = jnp.concatenate([xi, yj], axis=3)
    elif method == "diff":
        combined = xi - yj
    elif method == "cmp":
        combined = jnp.concatenate(
            [(xi < yj), (xi == yj), (xi > yj)], axis=3
        ).astype(jnp.float32)
    else:
        raise ValueError(method)
    if exclude_self:
        mask = (jnp.arange(N)[:, None] != jnp.arange(N)[None, :]).astype(jnp.float32)
        combined = combined * mask[None, :, :, None]
    return combined.astype(jnp.float32)


if __name__ == "__main__":
    failures = []

    def check(x, method, excl, tile=None):
        out = input_transform(x, method=method, exclude_self=excl, tile=tile)
        out = jax.block_until_ready(out)
        ref = _reference(x, method, excl)
        if out.shape != ref.shape or not bool(jnp.allclose(out, ref, atol=1e-6)):
            failures.append((x.shape, method, excl, tile))
            print(f"MISMATCH shape={x.shape} method={method} "
                  f"exclude_self={excl} tile={tile}")

    # Small case: single full-extent (i, j) block per batch.
    x = jax.random.normal(jax.random.PRNGKey(0), (2, 8, 32), dtype=jnp.float32)
    x = x.at[:, 3, :].set(x[:, 5, :])  # exact ties exercise the 'cmp' == branch
    for method in ("concat", "diff", "cmp"):
        for excl in (True, False):
            check(x, method, excl)

    # Multi-tile pair space (diagonal + off-diagonal blocks), unaligned D.
    x2 = jax.random.normal(jax.random.PRNGKey(1), (1, 16, 32), dtype=jnp.float32)
    check(x2, "concat", True, tile=8)
    check(x2, "cmp", True, tile=8)

    # Lane-aligned D (D % 128 == 0): slab path with aligned feature offsets.
    x3 = jax.random.normal(jax.random.PRNGKey(2), (1, 16, 128), dtype=jnp.float32)
    check(x3, "diff", True, tile=8)
    check(x3, "concat", False, tile=8)

    # N not divisible by the tile: edge blocks on both i and j.
    x4 = jax.random.normal(jax.random.PRNGKey(3), (1, 12, 32), dtype=jnp.float32)
    check(x4, "diff", True, tile=8)

    if not failures:
        print("KERNEL_OK")
</pallas_src>

<mosaic_0001>
module attributes {stable_mosaic.version = 11 : i64} {
  func.func @kernel(%arg0: i32, %arg1: i32, %arg2: i32, %arg3: memref<1x8x32xf32, #tpu.memory_space<vmem>>, %arg4: memref<1x8x32xf32, #tpu.memory_space<vmem>>, %arg5: memref<1x8x8x64xf32, #tpu.memory_space<vmem>>) attributes {dimension_semantics = [#tpu.dimension_semantics<parallel>, #tpu.dimension_semantics<parallel>, #tpu.dimension_semantics<parallel>], iteration_bounds = array<i64: 2, 1, 1>, scalar_prefetch = 0 : i64, scratch_operands = 0 : i64, tpu.core_type = #tpu.core_type<tc>, window_params = [{transform_indices = @transform_0, window_bounds = array<i64: 1, 8, 32>}, {transform_indices = @transform_1, window_bounds = array<i64: 1, 8, 32>}, {transform_indices = @transform_2, window_bounds = array<i64: 1, 8, 8, 64>}]} {
    %c0 = arith.constant 0 : index
    %c0_0 = arith.constant 0 : index
    %c0_1 = arith.constant 0 : index
    %0 = vector.load %arg3[%c0, %c0_0, %c0_1] : memref<1x8x32xf32, #tpu.memory_space<vmem>>, vector<1x8x32xf32>
    %1 = vector.shape_cast %0 : vector<1x8x32xf32> to vector<8x32xf32>
    %2 = vector.shape_cast %1 : vector<8x32xf32> to vector<8x1x32xf32>
    %c0_2 = arith.constant 0 : index
    %c0_3 = arith.constant 0 : index
    %c0_4 = arith.constant 0 : index
    %3 = vector.load %arg4[%c0_2, %c0_3, %c0_4] : memref<1x8x32xf32, #tpu.memory_space<vmem>>, vector<1x8x32xf32>
    %4 = vector.shape_cast %3 : vector<1x8x32xf32> to vector<8x32xf32>
    %5 = vector.shape_cast %4 : vector<8x32xf32> to vector<1x8x32xf32>
    %6 = arith.cmpi eq, %arg1, %arg2 : i32
    %7 = arith.extui %6 : i1 to i32
    %c0_i32 = arith.constant 0 : i32
    %8 = arith.cmpi ne, %7, %c0_i32 : i32
    scf.if %8 {
      %12 = tpu.iota {dimensions = array<i32: 0>} : vector<8x8x1xi32>
      %13 = tpu.iota {dimensions = array<i32: 1>} : vector<8x8x1xi32>
      %14 = arith.cmpi ne, %12, %13 : vector<8x8x1xi32>
      %15 = arith.extui %14 : vector<8x8x1xi1> to vector<8x8x1xi32>
      %16 = arith.sitofp %15 : vector<8x8x1xi32> to vector<8x8x1xf32>
      %17 = vector.shape_cast %2 : vector<8x1x32xf32> to vector<8x1x32xf32>
      %18 = vector.broadcast %17 : vector<8x1x32xf32> to vector<8x8x32xf32>
      %19 = vector.broadcast %16 : vector<8x8x1xf32> to vector<8x8x32xf32>
      %20 = arith.mulf %18, %19 : vector<8x8x32xf32>
      %c0_6 = arith.constant 0 : index
      %c0_7 = arith.constant 0 : index
      %c0_8 = arith.constant 0 : index
      %c0_9 = arith.constant 0 : index
      %21 = vector.load %arg5[%c0_6, %c0_7, %c0_8, %c0_9] : memref<1x8x8x64xf32, #tpu.memory_space<vmem>>, vector<1x8x8x32xf32>
      %22 = vector.shape_cast %21 : vector<1x8x8x32xf32> to vector<8x8x32xf32>
      %23 = vector.shape_cast %20 : vector<8x8x32xf32> to vector<1x8x8x32xf32>
      tpu.vector_store %arg5[%c0_6, %c0_7, %c0_8, %c0_9], %23 {strides = array<i32>} : memref<1x8x8x64xf32, #tpu.memory_space<vmem>>, vector<1x8x8x32xf32>,
      %24 = vector.shape_cast %5 : vector<1x8x32xf32> to vector<1x8x32xf32>
      %25 = vector.broadcast %24 : vector<1x8x32xf32> to vector<8x8x32xf32>
      %26 = vector.broadcast %16 : vector<8x8x1xf32> to vector<8x8x32xf32>
      %27 = arith.mulf %25, %26 : vector<8x8x32xf32>
      %c0_10 = arith.constant 0 : index
      %c0_11 = arith.constant 0 : index
      %c0_12 = arith.constant 0 : index
      %c32 = arith.constant 32 : index
      %28 = vector.load %arg5[%c0_10, %c0_11, %c0_12, %c32] : memref<1x8x8x64xf32, #tpu.memory_space<vmem>>, vector<1x8x8x32xf32>
      %29 = vector.shape_cast %28 : vector<1x8x8x32xf32> to vector<8x8x32xf32>
      %30 = vector.shape_cast %27 : vector<8x8x32xf32> to vector<1x8x8x32xf32>
      tpu.vector_store %arg5[%c0_10, %c0_11, %c0_12, %c32], %30 {strides = array<i32>} : memref<1x8x8x64xf32, #tpu.memory_space<vmem>>, vector<1x8x8x32xf32>,
    } else {
    }
    %true = arith.constant true
    %9 = arith.xori %6, %true : i1
    %10 = arith.extui %9 : i1 to i32
    %c0_i32_5 = arith.constant 0 : i32
    %11 = arith.cmpi ne, %10, %c0_i32_5 : i32
    scf.if %11 {
      %12 = vector.shape_cast %2 : vector<8x1x32xf32> to vector<8x1x32xf32>
      %13 = vector.broadcast %12 : vector<8x1x32xf32> to vector<8x8x32xf32>
      %c0_6 = arith.constant 0 : index
      %c0_7 = arith.constant 0 : index
      %c0_8 = arith.constant 0 : index
      %c0_9 = arith.constant 0 : index
      %14 = vector.load %arg5[%c0_6, %c0_7, %c0_8, %c0_9] : memref<1x8x8x64xf32, #tpu.memory_space<vmem>>, vector<1x8x8x32xf32>
      %15 = vector.shape_cast %14 : vector<1x8x8x32xf32> to vector<8x8x32xf32>
      %16 = vector.shape_cast %13 : vector<8x8x32xf32> to vector<1x8x8x32xf32>
      tpu.vector_store %arg5[%c0_6, %c0_7, %c0_8, %c0_9], %16 {strides = array<i32>} : memref<1x8x8x64xf32, #tpu.memory_space<vmem>>, vector<1x8x8x32xf32>,
      %17 = vector.shape_cast %5 : vector<1x8x32xf32> to vector<1x8x32xf32>
      %18 = vector.broadcast %17 : vector<1x8x32xf32> to vector<8x8x32xf32>
      %c0_10 = arith.constant 0 : index
      %c0_11 = arith.constant 0 : index
      %c0_12 = arith.constant 0 : index
      %c32 = arith.constant 32 : index
      %19 = vector.load %arg5[%c0_10, %c0_11, %c0_12, %c32] : memref<1x8x8x64xf32, #tpu.memory_space<vmem>>, vector<1x8x8x32xf32>
      %20 = vector.shape_cast %19 : vector<1x8x8x32xf32> to vector<8x8x32xf32>
      %21 = vector.shape_cast %18 : vector<8x8x32xf32> to vector<1x8x8x32xf32>
      tpu.vector_store %arg5[%c0_10, %c0_11, %c0_12, %c32], %21 {strides = array<i32>} : memref<1x8x8x64xf32, #tpu.memory_space<vmem>>, vector<1x8x8x32xf32>,
    } else {
    }
    return
  }
  func.func @transform_0(%arg0: i32, %arg1: i32, %arg2: i32) -> (i32, i32, i32) {
    %c0_i32 = arith.constant 0 : i32
    %c0_i32_0 = arith.constant 0 : i32
    return %arg0, %arg1, %c0_i32 : i32, i32, i32
  }
  func.func @transform_1(%arg0: i32, %arg1: i32, %arg2: i32) -> (i32, i32, i32) {
    %c0_i32 = arith.constant 0 : i32
    %c0_i32_0 = arith.constant 0 : i32
    return %arg0, %arg2, %c0_i32 : i32, i32, i32
  }
  func.func @transform_2(%arg0: i32, %arg1: i32, %arg2: i32) -> (i32, i32, i32, i32) {
    %c0_i32 = arith.constant 0 : i32
    %c0_i32_0 = arith.constant 0 : i32
    return %arg0, %arg1, %arg2, %c0_i32 : i32, i32, i32, i32
  }
}

</mosaic_0001>

<bundles_post_ra>
// kernel: _input_transform_impl.1
= control target key start
LH: loop header
LB: loop body
LE: loop exit
PB: predicated region body
PF: predicated region fallthrough
CT: control target
= control target key end

     0   :  { %7 = vsyncpa [#allocation3], 0  ;;  %s964_s0 = inlined_call_operand.hbm [shape: f32[2,8,32], index: 0, kind: input, shape index: {}, may-alias: {0,1}]   ;;  %s965_s1 = inlined_call_operand.hbm [shape: f32[2,8,32], index: 1, kind: input, shape index: {}, may-alias: {0,1}]   ;;  %s966_s2 = inlined_call_operand.hbm [shape: f32[2,8,8,64], index: 2, kind: output, shape index: {}]  }
   0x1   :  { %9 = vsyncpa [#allocation3 + $0x1], 0 }
   0x2   :  { %10 = vsyncpa [#allocation6], 0 }
   0x3   :  { %12 = vsyncpa [#allocation6 + $0x1], 0 }
   0x4   :  { %13 = vsyncpa [#allocation4], 0 }
   0x5   :  { %15 = vsyncpa [#allocation4 + $0x1], 0  ;;  %s790_s9 = smov 0   ;;  %s792_s10 = smov 0  }
   0x6   :  { %s794_s11 = smov 0   ;;  %s796_s12 = smov 0  }
   0x7   :  { %s798_s13 = smov 0   ;;  %s800_s14 = smov 0  }
   0x8 LB: > { %s526_s15 = sadd.s32 4294967295, %s769_s14   ;;  %s527_s16 = sadd.s32 4294967294, %s769_s14   ;;  %s769_s14 = sphi %s800_s14, %s21_s14   ;;  %s765_s13 = sphi %s798_s13, %s975_s13   ;;  %s761_s12 = sphi %s796_s12, %s974_s12   ;;  %s757_s11 = sphi %s794_s11, %s973_s11   ;;  %s753_s10 = sphi %s792_s10, %s972_s10   ;;  %s749_s9 = sphi %s790_s9, %s971_s9  }
   0x9   : > { %s40_s17 = sadd.s32 1, %s765_s13  ;;  %s49_s18 = sadd.s32 1, %s757_s11 }
   0xa   : > { %p42_p0 = scmp.ge.s32.totalorder %s40_s17, 2  ;;  %p56_p1 = scmp.ne.s32.totalorder %s757_s11, %s753_s10 }
   0xb   : > { %p57_p2 = scmp.eq.s32.totalorder %s769_s14, 0  ;;  %p62_p3 = scmp.ne.s32.totalorder %s753_s10, %s749_s9 }
   0xc   : > { %s977_s17 = smov (%p42_p0, %s40_s17), 0  ;;  %p63_p5 = scmp.eq.s32.totalorder %s526_s15, 0 }
   0xd   : > { %p831_p4 = por %p57_p2, %p56_p1  ;;  %s44_s20 = ssub.s32 %s765_s13, %s977_s17 }
   0xe   : > { %p118_p6 = scmp.eq.s32.totalorder %s526_s15, 1  ;;  %p47_p7 = scmp.eq.s32.totalorder %s44_s20, 0 }
   0xf   : > { %p837_p8 = por %p63_p5, %p62_p3  ;;  %p124_p10 = scmp.eq.s32.totalorder %s527_s16, 1 }
  0x10   : > { %p841_p9 = por %p118_p6, %p56_p1  ;;  %p529_p12 = scmp.ge.s32.totalorder %s769_s14, 2 }
  0x11   : > { %s846_s23 = scalar_select %p47_p7, %s757_s11, %s49_s18  }
  0x12   : > { %p848_p11 = por %p124_p10, %p62_p3  ;;  %p569_p13 = scmp.lt.s32.totalorder %s769_s14, 2 }
  0x13   : > { %s144_s25 = sand.u32 1, %s757_s11   ;;  %s531_s27 = sshll.u32 %s765_s13, 3 }
  0x14   : > { %s530_s26 = sshll.u32 %s144_s25, 3  ;;  %s153_s30 = scalar_lea.hbm %s964_s0, %s531_s27 }
  0x15   : > { %s148_s3 = scalar_lea.vmem [#allocation2], %s530_s26  ;;  %s155_s5 = sshll.u32 %s153_s30, 4  ;;  %s156_s5 = int_to_ptr.hbm [resolvable:$true] %s155_s5 }
  0x16   : > { %s157_s4 = sshll.u32 %s148_s3, 4  ;;  %p559_p0 = pnand %p569_p13, %p831_p4  ;;  %s158_s4 = int_to_ptr.vmem [resolvable:$true] %s157_s4 }
  0x17   : > { %p534_p1 = scmp.ge.s32.totalorder %s769_s14, 1  ;;  %p182_p2 = scmp.lt.s32.totalorder %s769_s14, 3 }
  0x18   : > { %s145_s6 = scalar_lea.sflag [#allocation3], %s144_s25  ;;  %s173_s15 = scalar_lea.hbm %s965_s1, %s531_s27 }
  0x19   : > { %561 = dma.hbm_to_vmem [thread:$0]  (!%p559_p0), %s156_s5, 128, %s158_s4, %s145_s6  }
  0x1a   : > { %p183_p3 = pnand %p534_p1, %p182_p2  ;;  %s168_s16 = scalar_lea.vmem [#allocation5], %s530_s26 }
  0x1b   : > { %s177_s18 = sshll.u32 %s168_s16, 4  ;;  %s175_s20 = sshll.u32 %s173_s15, 4  ;;  %s178_s18 = int_to_ptr.vmem [resolvable:$true] %s177_s18  ;;  %s176_s20 = int_to_ptr.hbm [resolvable:$true] %s175_s20 }
  0x1c   : > { %s165_s28 = scalar_lea.sflag [#allocation6], %s144_s25  ;;  %186 = sbr.rel (%p183_p3) target bundleno = 180 (0xb4), region = 28 }
  0x1d   : > { %564 = dma.hbm_to_vmem [thread:$0]  (!%p559_p0), %s176_s20, 128, %s178_s18, %s165_s28  }
  0x1e   : > { %s867_s19 = sand.u32 (!%p183_p3), 1, %s753_s10  }
  0x1f   : > { %s535_s29 = sshll.u32 (!%p183_p3), %s867_s19, 3  ;;  %s189_s30 = scalar_lea.sflag (!%p183_p3), [#allocation3], %s867_s19 }
  0x20   : > { %s192_s3 = scalar_lea.vmem (!%p183_p3), [#allocation2], %s535_s29 }
  0x21   : > { %736 = dma.done.wait (%p837_p8), %s189_s30, 128  }
  0x22   : > { %738 = vsyncadd (%p837_p8), %s189_s30, 4294967168  ;;  %s199_s26 = scalar_lea.sflag [#allocation6], %s867_s19  ;;  %s202_s25 = scalar_lea.vmem [#allocation5], %s535_s29 }
  0x23   : > { %740 = dma.done.wait (%p837_p8), %s199_s26, 128  }
  0x24   : > { %742 = vsyncadd (%p837_p8), %s199_s26, 4294967168  ;;  %v244_v0 = vlaneseq  ;;  %v771_v2 = vmov 0.0   ;;  %s537_s27 = sshll.u32 %s867_s19, 6  ;;  %vm294_vm4 = vcmask 261120   ;;  %v239_v5 = vld [vmem:[%s202_s25] sm:$0xff]  ;;  %v230_v6 = vld [vmem:[%s192_s3] sm:$0xff] }
  0x25   : > { %v233_v10 = vrot.slane %v230_v6, 2  ;;  %v270_v12 = vperm.slane %v230_v6, 0  ;;  %v234_v13 = vrot.slane %v230_v6, 3  ;;  %v232_v14 = vrot.slane %v230_v6, 1  ;;  %s772_s21 = smov 32   ;;  %s884_s4 = scalar_lea.vmem [#allocation7], %s537_s27 }
  0x26   : > { %v245_v1 = vshrl.u32 %v244_v0, 7  ;;  %v238_v19 = vrot.slane %v230_v6, 7  ;;  %v237_v23 = vrot.slane %v230_v6, 6  ;;  %v235_v27 = vrot.slane %v230_v6, 4  ;;  %s551_s5 = sshll.u32 %s761_s12, 6  ;;  %s410_s15 = sshll.u32 %s884_s4, 4  ;;  %s411_s15 = int_to_ptr.vmem [resolvable:$true] %s410_s15 }
  0x27   : > { %v272_v16 = vperm.slane %v233_v10, 0  ;;  %v273_v20 = vperm.slane %v234_v13, 0  ;;  %v271_v21 = vperm.slane %v232_v14, 0  ;;  %v236_v35 = vrot.slane %v230_v6, 5  ;;  %s409_s8 = scalar_lea.hbm %s966_s2, %s551_s5  ;;  %s395_s12 = scalar_lea.sflag [#allocation4], %s867_s19 }
  0x28   : > { %vm248_vm0 = vcmp.ne.s32.totalorder %v245_v1, 2  ;;  %vm246_vm1 = vcmp.ne.s32.totalorder %v245_v1, 0  ;;  %vm249_vm2 = vcmp.ne.s32.totalorder %v245_v1, 3  ;;  %vm247_vm3 = vcmp.ne.s32.totalorder %v245_v1, 1  ;;  %s412_s16 = sshll.u32 %s409_s8, 4  ;;  %s703_s30 = scalar_lea.hbm %s966_s2, 128  ;;  %s413_s16 = int_to_ptr.hbm [resolvable:$true] %s412_s16 }
  0x29   : > { %v540_v3 = vsel %vm248_vm0, 1.0, %v771_v2  ;;  %v538_v4 = vsel %vm246_vm1, 1.0, %v771_v2  ;;  %vm250_vm5 = vcmp.ne.s32.totalorder %v245_v1, 4  ;;  %v541_v7 = vsel %vm249_vm2, 1.0, %v771_v2  ;;  %s697_s18 = sshra.s32 %s413_s16, 4  ;;  %s698_s18 = int_to_ptr.hbm [resolvable:$true] %s697_s18 }
  0x2a   : > { %v539_v8 = vsel %vm247_vm3, 1.0, %v771_v2  ;;  %vm253_vm6 = vcmp.ne.s32.totalorder %v245_v1, 7  ;;  %vm252_vm7 = vcmp.ne.s32.totalorder %v245_v1, 6  ;;  %v305_v9 = vmul.f32 %v540_v3, %v239_v5  ;;  %s699_s20 = scalar_lea.hbm %s698_s18, 64  ;;  %p704_p7 = scmp.lt.s32.totalorder %s698_s18, %s966_s2 }
  0x2b   : > { %v303_v11 = vmul.f32 %v538_v4, %v239_v5  ;;  %v542_v15 = vsel %vm250_vm5, 1.0, %v771_v2  ;;  %vm251_vm8 = vcmp.ne.s32.totalorder %v245_v1, 5  ;;  %v286_v17 = vmul.f32 %v538_v4, %v270_v12  ;;  %p700_p4 = scmp.ne.s32.totalorder %s698_s18, %s699_s20  ;;  %p705_p8 = scmp.lt.s32.totalorder %s703_s30, %s699_s20 }
  0x2c   : > { %323 = vrot.lane.b32.xlu1 %v305_v9, %s772_s21  ;;  %v545_v18 = vsel %vm253_vm6, 1.0, %v771_v2  ;;  %v544_v22 = vsel %vm252_vm7, 1.0, %v771_v2  ;;  %v288_v24 = vmul.f32 %v540_v3, %v272_v16  ;;  %v277_v25 = vperm.slane %v238_v19, 0 }
  0x2d   : > { %319 = vrot.lane.b32.xlu0 %v303_v11, %s772_s21  ;;  %295 = vst.msk [vmem:[%s884_s4] sm:$0xff] %vm294_vm4, %v286_v17  ;;  %v307_v26 = vmul.f32 %v542_v15, %v239_v5  ;;  %v306_v28 = vmul.f32 %v541_v7, %v239_v5  ;;  %v289_v29 = vmul.f32 %v541_v7, %v273_v20  ;;  %v276_v31 = vperm.slane %v237_v23, 0  ;;  %p701_p5 = pnand %p700_p4, %p841_p9  ;;  %p706_p10 = por %p705_p8, %p704_p7 }
  0x2e   : > { %v287_v30 = vmul.f32 %v539_v8, %v271_v21  ;;  %297 = vst.msk [vmem:[%s884_s4 + $0x10] sm:$0xff] %vm294_vm4, %v288_v24  ;;  %v304_v32 = vmul.f32 %v539_v8, %v239_v5  ;;  %v293_v33 = vmul.f32 %v545_v18, %v277_v25  ;;  %v274_v34 = vperm.slane %v235_v27, 0 }
  0x2f   : > { %327 = vrot.lane.b32.xlu2 %v307_v26, %s772_s21  ;;  %298 = vst.msk [vmem:[%s884_s4 + $0x18] sm:$0xff] %vm294_vm4, %v289_v29  ;;  %v292_v36 = vmul.f32 %v544_v22, %v276_v31  ;;  %v543_v37 = vsel %vm251_vm8, 1.0, %v771_v2  ;;  %v275_v39 = vperm.slane %v236_v35, 0  ;;  %v310_v42 = vmul.f32 %v545_v18, %v239_v5  ;;  %p702_p6 = pneg %p701_p5 }
  0x30   : > { %296 = vst.msk [vmem:[%s884_s4 + $0x8] sm:$0xff] %vm294_vm4, %v287_v30  ;;  %v290_v38 = vmul.f32 %v542_v15, %v274_v34  ;;  %v308_v40 = vmul.f32 %v543_v37, %v239_v5  ;;  %v309_v43 = vmul.f32 %v544_v22, %v239_v5  ;;  %vm343_vm9 = vcmask 523520  }
  0x31   : > { %302 = vst.msk [vmem:[%s884_s4 + $0x38] sm:$0xff] %vm294_vm4, %v293_v33  ;;  %v291_v41 = vmul.f32 %v543_v37, %v275_v39  ;;  %p707_p13 = pnand %p706_p10, %p702_p6 }
  0x32   : > { %301 = vst.msk [vmem:[%s884_s4 + $0x30] sm:$0xff] %vm294_vm4, %v292_v36 }
  0x33   : > { %299 = vst.msk [vmem:[%s884_s4 + $0x20] sm:$0xff] %vm294_vm4, %v290_v38 }
  0x34   : > { %325 = vrot.lane.b32.xlu1 %v306_v28, %s772_s21  ;;  %300 = vst.msk [vmem:[%s884_s4 + $0x28] sm:$0xff] %vm294_vm4, %v291_v41 }
  0x35   : > { %321 = vrot.lane.b32.xlu0 %v304_v32, %s772_s21 }
  0x37   : > { %329 = vrot.lane.b32.xlu2 %v308_v40, %s772_s21 }
  0x3c   : > { %333 = vrot.lane.b32.xlu1 %v310_v42, %s772_s21 }
  0x3d   : > { %331 = vrot.lane.b32.xlu0 %v309_v43, %s772_s21 }
  0x89   : > { %v328_v44 = vpop.permute.xlu2 %327 }
  0x8a   : > { %348 = vst.msk [vmem:[%s884_s4 + $0x20] sm:$0xff] %vm343_vm9, %v328_v44 }
  0x91   : > { %v330_v45 = vpop.permute.xlu2 %329 }
  0x92   : > { %349 = vst.msk [vmem:[%s884_s4 + $0x28] sm:$0xff] %vm343_vm9, %v330_v45 }
  0x9e   : > { %v324_v46 = vpop.permute.xlu1 %323 }
  0x9f   : > { %v320_v47 = vpop.permute.xlu0 %319  ;;  %346 = vst.msk [vmem:[%s884_s4 + $0x10] sm:$0xff] %vm343_vm9, %v324_v46 }
  0xa0   : > { %344 = vst.msk [vmem:[%s884_s4] sm:$0xff] %vm343_vm9, %v320_v47 }
  0xa6   : > { %v326_v48 = vpop.permute.xlu1 %325 }
  0xa7   : > { %v322_v49 = vpop.permute.xlu0 %321  ;;  %347 = vst.msk [vmem:[%s884_s4 + $0x18] sm:$0xff] %vm343_vm9, %v326_v48 }
  0xa8   : > { %345 = vst.msk [vmem:[%s884_s4 + $0x8] sm:$0xff] %vm343_vm9, %v322_v49 }
  0xae   : > { %v334_v50 = vpop.permute.xlu1 %333 }
  0xaf   : > { %v332_v51 = vpop.permute.xlu0 %331  ;;  %351 = vst.msk [vmem:[%s884_s4 + $0x38] sm:$0xff] %vm343_vm9, %v334_v50 }
  0xb0   : > { %350 = vst.msk [vmem:[%s884_s4 + $0x30] sm:$0xff] %vm343_vm9, %v332_v51 }
  0xb1   : > { %710 = shalt.err (!%p707_p13)
}
  0xb2   : > { %s773_s19 = smov 128   ;;  %s774_s25 = smov 8  }
  0xb3   : > { %556 = dma.vmem_to_hbm [thread:$0]  (%p841_p9), %s411_s15, 1024, %s413_s16, %s395_s12, %s773_s19, %s773_s19, %s774_s25  }
  0xb4 PF: > { %s427_s27 = sand.u32 1, %s749_s9   ;;  %p566_p0 = pnand %p529_p12, %p848_p11 }
  0xb5   : > { %s428_s21 = scalar_lea.sflag [#allocation4], %s427_s27 }
  0xb6   : > { %p567_p1 = pneg %p566_p0 }
  0xb8   : > { %744 = dma.done.wait (%p567_p1), %s428_s21, 1024  }
  0xb9   : > { %746 = vsyncadd (%p567_p1), %s428_s21, 4294966272  ;;  %s21_s14 = sadd.s32 1, %s769_s14   ;;  %s971_s9 = smov %s753_s10 }
  0xba   : > { %p18_p2 = scmp.ge.s32.totalorder %s21_s14, 4   ;;  %s972_s10 = smov %s757_s11 }
  0xbb   : > { %s973_s11 = smov %s846_s23  ;;  %s974_s12 = smov %s765_s13 }
  0xbc   : > { %s975_s13 = smov %s977_s17  ;;  %20 = sbr.rel (!%p18_p2) target bundleno = 8 (0x8), region = 94 }
  0xc1   :  { %434 = vsyncpa [#allocation3], 1 }
  0xc2   :  { %436 = vsyncpa [#allocation3 + $0x1], 1 }
  0xc3   :  { %437 = vsyncpa [#allocation6], 1 }
  0xc4   :  { %439 = vsyncpa [#allocation6 + $0x1], 1 }
  0xc5   :  { %440 = vsyncpa [#allocation4], 1 }
  0xc6   :  { %442 = vsyncpa [#allocation4 + $0x1], 1 }

</bundles_post_ra>
